<compile_context>
chip_gen: v7x
topology: tpu7x:2x2x1
jax: 0.10.0
libtpu: 0.0.40
codegen_flags: <defaults>
</compile_context>

<pallas_src>
import functools

import jax
import jax.numpy as jnp
from jax.experimental import pallas as pl
from jax.experimental.pallas import tpu as pltpu

# ----------------------------- config ---------------------------------------
WEIGHT_CE = 1.0
WEIGHT_DICE = 1.0
SMOOTH = 1e-5
TOPK_PERCENT = 10
RB_CAP = 64  # max sublane rows per pixel tile -> up to 64*128 = 8192 pixels/block


def _pick_rb(r, cap=RB_CAP):
    """Pick a row-tile size that divides r and satisfies the (8,128) block rule."""
    if r <= cap:
        return r  # block second-to-last dim equals full array dim -> allowed
    best = 0
    for rb in range(8, cap + 1, 8):  # multiples of 8 dividing r
        if r % rb == 0:
            best = rb
    return best if best else r


# ------------------------ kernel 1: CE + dice partials -----------------------
def ce_dice_partial_kernel(logits_ref, tgt_ref, ce_ref, tp_ref, ps_ref, cnt_ref):
    """Per-pixel cross-entropy + per-class partial sums for dice.

    logits_ref: (C, RB, 128) f32   tgt_ref: (RB, 128) i32
    ce_ref:     (RB, 128) f32      tp/ps/cnt_ref: (C, 1) f32 per-batch accumulators
      tp  = sum_pixels softmax[target-class]       (true positives)
      ps  = sum_pixels softmax (per class)         (-> fp = ps - tp)
      cnt = per-class label counts                 (-> fn = cnt - tp)
    """
    i = pl.program_id(1)

    @pl.when(i == 0)
    def _init():
        tp_ref[...] = jnp.zeros_like(tp_ref)
        ps_ref[...] = jnp.zeros_like(ps_ref)
        cnt_ref[...] = jnp.zeros_like(cnt_ref)

    logits = logits_ref[...].astype(jnp.float32)              # (C, RB, 128)
    tgt = tgt_ref[...]                                         # (RB, 128) int32
    C, RB, LN = logits.shape

    cls = jax.lax.broadcasted_iota(jnp.int32, (C, RB, LN), 0)  # class ids, full shape
    onehot = (cls == tgt[None, :, :]).astype(jnp.float32)      # (C, RB, 128)

    # softmax / log-softmax over the class axis (leading dim -> plain VPU ops)
    m = jnp.max(logits, axis=0, keepdims=True)                 # (1, RB, 128)
    ex = jnp.exp(logits - m)                                   # (C, RB, 128) EUP
    s = jnp.sum(ex, axis=0, keepdims=True)                     # (1, RB, 128)
    inv_s = pl.reciprocal(s)                                   # exact, 1/C of the divides
    p = ex * inv_s                                             # softmax

    # CE(pixel) = logsumexp(logits) - logit[target]  (>= 0 numerically)
    logit_t = jnp.sum(logits * onehot, axis=0)                 # (RB, 128)
    ce_ref[...] = jnp.log(s[0]) + m[0] - logit_t

    # dice partials over this pixel tile (batch_dice=True -> global sums)
    tp_ref[...] += jnp.sum(jnp.sum(p * onehot, axis=-1), axis=-1, keepdims=True)
    ps_ref[...] += jnp.sum(jnp.sum(p, axis=-1), axis=-1, keepdims=True)
    cnt_ref[...] += jnp.sum(jnp.sum(onehot, axis=-1), axis=-1, keepdims=True)


# ------------------------ kernel 2: finalize (top-k + dice) -------------------
def finalize_kernel(ce_ref, tp_ref, ps_ref, cnt_ref, out_ref, *, k_count):
    """Exact top-k CE via 31-pass bit-threshold search + SoftDice finalize.

    ce_ref: (B, R, 128) f32 (all >= 0); tp/ps/cnt_ref: (B, C, 1) f32.
    """
    ce = jnp.maximum(ce_ref[...], 0.0)                         # clamp for bit-order safety
    # Non-negative f32 bit patterns are order-preserving as int32.
    bits = pltpu.bitcast(ce, jnp.int32)

    # Greedy bit-by-bit search for T = bit pattern of the k-th largest value:
    # maximum integer T with count(bits >= T) >= k.  31 vectorized passes, exact.
    t = jnp.int32(0)
    for b in range(30, -1, -1):
        cand = t + jnp.int32(1 << b)   # bit b of t is still 0 -> '+' == '|'
        cnt_ge = jnp.sum((bits >= cand).astype(jnp.int32))
        t = jnp.where(cnt_ge >= k_count, cand, t)

    gt = bits > t
    cnt_gt = jnp.sum(gt.astype(jnp.int32))                     # < k_count
    sum_gt = jnp.sum(jnp.where(gt, ce, 0.0))
    # value whose bit pattern == t (at least one element matches; ce >= 0)
    thr_val = jnp.max(jnp.where(bits == t, ce, 0.0))
    topk_sum = sum_gt + (jnp.int32(k_count) - cnt_gt).astype(jnp.float32) * thr_val
    ce_loss = topk_sum / jnp.float32(k_count)

    # SoftDice (batch_dice=True, do_bg=False)
    tp = jnp.sum(tp_ref[...], axis=0)                          # (C, 1)
    ps = jnp.sum(ps_ref[...], axis=0)
    cnt = jnp.sum(cnt_ref[...], axis=0)
    fp = ps - tp
    fn = cnt - tp
    C = tp.shape[0]

    nominator = 2.0 * tp + SMOOTH
    denominator = jnp.maximum(2.0 * tp + fp + fn + SMOOTH, 1e-8)
    dc = nominator / denominator                               # (C, 1)
    dc_loss = -(jnp.sum(dc[1:, :]) / jnp.float32(C - 1))

    out_ref[0, 0] = jnp.float32(WEIGHT_CE) * ce_loss + jnp.float32(WEIGHT_DICE) * dc_loss


# ------------------------------- wrapper --------------------------------------
def dc_and_topk_loss(net_output, target):
    """net_output: (B, C, H, W) float32 logits; target: (B, 1, H, W) int32 labels."""
    B, C, H, W = net_output.shape
    assert C >= 2, "do_bg=False dice needs at least 2 classes"
    HW = H * W
    assert HW % 128 == 0, "spatial pixel count per batch must be a multiple of 128"
    R = HW // 128
    RB = _pick_rb(R)
    n_tiles = R // RB
    N = B * HW

    # free reshapes only (no transpose / extra HBM pass): pixels -> (rows, 128) lanes
    logits = net_output.reshape(B, C, R, 128)
    tgt = target.astype(jnp.int32).reshape(B, R, 128)

    ce, tp, ps, cnt = pl.pallas_call(
        ce_dice_partial_kernel,
        out_shape=(
            jax.ShapeDtypeStruct((B, R, 128), jnp.float32),
            jax.ShapeDtypeStruct((B, C, 1), jnp.float32),
            jax.ShapeDtypeStruct((B, C, 1), jnp.float32),
            jax.ShapeDtypeStruct((B, C, 1), jnp.float32),
        ),
        grid_spec=pltpu.PrefetchScalarGridSpec(
            num_scalar_prefetch=0,
            grid=(B, n_tiles),
            in_specs=[
                pl.BlockSpec((None, C, RB, 128), lambda b, i: (b, 0, i, 0)),
                pl.BlockSpec((None, RB, 128), lambda b, i: (b, i, 0)),
            ],
            out_specs=(
                pl.BlockSpec((None, RB, 128), lambda b, i: (b, i, 0)),
                pl.BlockSpec((None, C, 1), lambda b, i: (b, 0, 0)),  # per-b accumulators
                pl.BlockSpec((None, C, 1), lambda b, i: (b, 0, 0)),  #  (race-free under
                pl.BlockSpec((None, C, 1), lambda b, i: (b, 0, 0)),  #   parallel batch axis)
            ),
        ),
        compiler_params=pltpu.CompilerParams(
            dimension_semantics=("parallel", "arbitrary")),
    )(logits, tgt)

    k_count = max(1, int(N * TOPK_PERCENT / 100))  # matches int(num_voxels * k / 100)

    # Finalize loads the whole CE once into VMEM for the 31-pass bit search.
    # Raise the scoped VMEM limit deliberately if the default 32 MiB would not fit.
    # TODO(synk): for multi-million-voxel inputs on v7x (64 MiB VMEM), tile the
    # finalize over pixel chunks (carry the bit search across grid steps) instead.
    ce_bytes = B * R * 128 * 4
    fin_kwargs = {}
    needed = 2 * ce_bytes + (1 << 20)
    if needed > (32 << 20):
        fin_kwargs["vmem_limit_bytes"] = min(needed, 60 << 20)

    loss = pl.pallas_call(
        functools.partial(finalize_kernel, k_count=k_count),
        out_shape=jax.ShapeDtypeStruct((1, 1), jnp.float32),
        grid=(1,),
        in_specs=[
            pl.BlockSpec((B, R, 128), lambda i: (0, 0, 0)),
            pl.BlockSpec((B, C, 1), lambda i: (0, 0, 0)),
            pl.BlockSpec((B, C, 1), lambda i: (0, 0, 0)),
            pl.BlockSpec((B, C, 1), lambda i: (0, 0, 0)),
        ],
        out_specs=pl.BlockSpec((1, 1), lambda i: (0, 0)),
        compiler_params=pltpu.CompilerParams(**fin_kwargs),
    )(ce, tp, ps, cnt)

    return loss[0, 0]


# --------------------------- pure-JAX reference --------------------------------
def reference_loss(net_output, target):
    B, C, H, W = net_output.shape
    x = jax.nn.softmax(net_output, axis=1)
    onehot = jax.nn.one_hot(target[:, 0], C, axis=1, dtype=jnp.float32)  # (B,C,H,W)
    tp = jnp.sum(x * onehot, axis=(0, 2, 3))
    fp = jnp.sum(x * (1.0 - onehot), axis=(0, 2, 3))
    fn = jnp.sum((1.0 - x) * onehot, axis=(0, 2, 3))
    dc = (2 * tp + SMOOTH) / jnp.maximum(2 * tp + fp + fn + SMOOTH, 1e-8)
    dc_loss = -jnp.mean(dc[1:])

    logp = jax.nn.log_softmax(net_output, axis=1)
    ce = -jnp.take_along_axis(logp, target, axis=1)[:, 0]   # (B,H,W)
    n = ce.size
    kk = max(1, int(n * TOPK_PERCENT / 100))
    ce_loss = jnp.mean(jax.lax.top_k(ce.reshape(-1), kk)[0])
    return WEIGHT_CE * ce_loss + WEIGHT_DICE * dc_loss


# --------------------------------- main ----------------------------------------
if __name__ == "__main__":
    B, C, H, W = 2, 4, 16, 16
    key = jax.random.PRNGKey(0)
    k1, k2 = jax.random.split(key)
    net_output = jax.random.normal(k1, (B, C, H, W), dtype=jnp.float32)
    target = jax.random.randint(k2, (B, 1, H, W), 0, C, dtype=jnp.int32)

    loss = jax.block_until_ready(dc_and_topk_loss(net_output, target))
    ref = jax.block_until_ready(reference_loss(net_output, target))

    assert jnp.allclose(loss, ref, rtol=1e-4, atol=1e-5), (loss, ref)
    print("KERNEL_OK")
</pallas_src>

<mosaic_0001>
module attributes {stable_mosaic.version = 11 : i64} {
  func.func @ce_dice_partial_kernel(%arg0: i32, %arg1: i32, %arg2: memref<1x4x2x128xf32, #tpu.memory_space<vmem>>, %arg3: memref<1x2x128xi32, #tpu.memory_space<vmem>>, %arg4: memref<1x2x128xf32, #tpu.memory_space<vmem>>, %arg5: memref<1x4x1xf32, #tpu.memory_space<vmem>>, %arg6: memref<1x4x1xf32, #tpu.memory_space<vmem>>, %arg7: memref<1x4x1xf32, #tpu.memory_space<vmem>>) attributes {dimension_semantics = [#tpu.dimension_semantics<parallel>, #tpu.dimension_semantics<arbitrary>], iteration_bounds = array<i64: 2, 1>, scalar_prefetch = 0 : i64, scratch_operands = 0 : i64, tpu.core_type = #tpu.core_type<tc>, window_params = [{transform_indices = @transform_0, window_bounds = array<i64: 1, 4, 2, 128>}, {transform_indices = @transform_1, window_bounds = array<i64: 1, 2, 128>}, {transform_indices = @transform_2, window_bounds = array<i64: 1, 2, 128>}, {transform_indices = @transform_3, window_bounds = array<i64: 1, 4, 1>}, {transform_indices = @transform_4, window_bounds = array<i64: 1, 4, 1>}, {transform_indices = @transform_5, window_bounds = array<i64: 1, 4, 1>}]} {
    %c0_i32 = arith.constant 0 : i32
    %0 = arith.cmpi eq, %arg1, %c0_i32 : i32
    %1 = arith.extui %0 : i1 to i32
    %c0_i32_0 = arith.constant 0 : i32
    %2 = arith.cmpi ne, %1, %c0_i32_0 : i32
    scf.if %2 {
      %cst_36 = arith.constant 0.000000e+00 : f32
      %61 = vector.broadcast %cst_36 : f32 to vector<4x1xf32>
      %c0_37 = arith.constant 0 : index
      %c0_38 = arith.constant 0 : index
      %c0_39 = arith.constant 0 : index
      %62 = vector.load %arg5[%c0_37, %c0_38, %c0_39] : memref<1x4x1xf32, #tpu.memory_space<vmem>>, vector<1x4x1xf32>
      %63 = vector.shape_cast %62 : vector<1x4x1xf32> to vector<4x1xf32>
      %64 = vector.shape_cast %61 : vector<4x1xf32> to vector<1x4x1xf32>
      tpu.vector_store %arg5[%c0_37, %c0_38, %c0_39], %64 {strides = array<i32>} : memref<1x4x1xf32, #tpu.memory_space<vmem>>, vector<1x4x1xf32>,
      %cst_40 = arith.constant 0.000000e+00 : f32
      %65 = vector.broadcast %cst_40 : f32 to vector<4x1xf32>
      %c0_41 = arith.constant 0 : index
      %c0_42 = arith.constant 0 : index
      %c0_43 = arith.constant 0 : index
      %66 = vector.load %arg6[%c0_41, %c0_42, %c0_43] : memref<1x4x1xf32, #tpu.memory_space<vmem>>, vector<1x4x1xf32>
      %67 = vector.shape_cast %66 : vector<1x4x1xf32> to vector<4x1xf32>
      %68 = vector.shape_cast %65 : vector<4x1xf32> to vector<1x4x1xf32>
      tpu.vector_store %arg6[%c0_41, %c0_42, %c0_43], %68 {strides = array<i32>} : memref<1x4x1xf32, #tpu.memory_space<vmem>>, vector<1x4x1xf32>,
      %cst_44 = arith.constant 0.000000e+00 : f32
      %69 = vector.broadcast %cst_44 : f32 to vector<4x1xf32>
      %c0_45 = arith.constant 0 : index
      %c0_46 = arith.constant 0 : index
      %c0_47 = arith.constant 0 : index
      %70 = vector.load %arg7[%c0_45, %c0_46, %c0_47] : memref<1x4x1xf32, #tpu.memory_space<vmem>>, vector<1x4x1xf32>
      %71 = vector.shape_cast %70 : vector<1x4x1xf32> to vector<4x1xf32>
      %72 = vector.shape_cast %69 : vector<4x1xf32> to vector<1x4x1xf32>
      tpu.vector_store %arg7[%c0_45, %c0_46, %c0_47], %72 {strides = array<i32>} : memref<1x4x1xf32, #tpu.memory_space<vmem>>, vector<1x4x1xf32>,
    } else {
    }
    %c0 = arith.constant 0 : index
    %c0_1 = arith.constant 0 : index
    %c0_2 = arith.constant 0 : index
    %c0_3 = arith.constant 0 : index
    %3 = vector.load %arg2[%c0, %c0_1, %c0_2, %c0_3] : memref<1x4x2x128xf32, #tpu.memory_space<vmem>>, vector<1x4x2x128xf32>
    %4 = vector.shape_cast %3 : vector<1x4x2x128xf32> to vector<4x2x128xf32>
    %c0_4 = arith.constant 0 : index
    %c0_5 = arith.constant 0 : index
    %c0_6 = arith.constant 0 : index
    %5 = vector.load %arg3[%c0_4, %c0_5, %c0_6] : memref<1x2x128xi32, #tpu.memory_space<vmem>>, vector<1x2x128xi32>
    %6 = vector.shape_cast %5 : vector<1x2x128xi32> to vector<2x128xi32>
    %7 = tpu.iota {dimensions = array<i32: 0>} : vector<4x2x128xi32>
    %8 = vector.shape_cast %6 : vector<2x128xi32> to vector<1x2x128xi32>
    %9 = vector.broadcast %8 : vector<1x2x128xi32> to vector<4x2x128xi32>
    %10 = arith.cmpi eq, %7, %9 : vector<4x2x128xi32>
    %11 = arith.extui %10 : vector<4x2x128xi1> to vector<4x2x128xi32>
    %12 = arith.sitofp %11 : vector<4x2x128xi32> to vector<4x2x128xf32>
    %cst = arith.constant dense<0xFF800000> : vector<2x128xf32>
    %13 = vector.multi_reduction <maximumf>, %4, %cst [0] : vector<4x2x128xf32> to vector<2x128xf32>
    %14 = vector.shape_cast %13 : vector<2x128xf32> to vector<1x2x128xf32>
    %15 = vector.broadcast %14 : vector<1x2x128xf32> to vector<4x2x128xf32>
    %16 = arith.subf %4, %15 : vector<4x2x128xf32>
    %17 = math.exp %16 : vector<4x2x128xf32>
    %cst_7 = arith.constant dense<0.000000e+00> : vector<2x128xf32>
    %18 = vector.multi_reduction <add>, %17, %cst_7 [0] : vector<4x2x128xf32> to vector<2x128xf32>
    %19 = vector.shape_cast %18 : vector<2x128xf32> to vector<1x2x128xf32>
    %20 = tpu.reciprocal %19 : vector<1x2x128xf32> -> vector<1x2x128xf32>
    %21 = vector.broadcast %20 : vector<1x2x128xf32> to vector<4x2x128xf32>
    %22 = arith.mulf %17, %21 : vector<4x2x128xf32>
    %23 = arith.mulf %4, %12 : vector<4x2x128xf32>
    %cst_8 = arith.constant dense<0.000000e+00> : vector<2x128xf32>
    %24 = vector.multi_reduction <add>, %23, %cst_8 [0] : vector<4x2x128xf32> to vector<2x128xf32>
    %25 = vector.shape_cast %19 : vector<1x2x128xf32> to vector<2x128xf32>
    %26 = math.log %25 : vector<2x128xf32>
    %27 = vector.shape_cast %14 : vector<1x2x128xf32> to vector<2x128xf32>
    %28 = arith.addf %26, %27 : vector<2x128xf32>
    %29 = arith.subf %28, %24 : vector<2x128xf32>
    %c0_9 = arith.constant 0 : index
    %c0_10 = arith.constant 0 : index
    %c0_11 = arith.constant 0 : index
    %30 = vector.load %arg4[%c0_9, %c0_10, %c0_11] : memref<1x2x128xf32, #tpu.memory_space<vmem>>, vector<1x2x128xf32>
    %31 = vector.shape_cast %30 : vector<1x2x128xf32> to vector<2x128xf32>
    %32 = vector.shape_cast %29 : vector<2x128xf32> to vector<1x2x128xf32>
    tpu.vector_store %arg4[%c0_9, %c0_10, %c0_11], %32 {strides = array<i32>} : memref<1x2x128xf32, #tpu.memory_space<vmem>>, vector<1x2x128xf32>,
    %c0_12 = arith.constant 0 : index
    %c0_13 = arith.constant 0 : index
    %c0_14 = arith.constant 0 : index
    %33 = vector.load %arg5[%c0_12, %c0_13, %c0_14] : memref<1x4x1xf32, #tpu.memory_space<vmem>>, vector<1x4x1xf32>
    %34 = vector.shape_cast %33 : vector<1x4x1xf32> to vector<4x1xf32>
    %35 = arith.mulf %22, %12 : vector<4x2x128xf32>
    %cst_15 = arith.constant dense<0.000000e+00> : vector<4x2xf32>
    %36 = vector.multi_reduction <add>, %35, %cst_15 [2] : vector<4x2x128xf32> to vector<4x2xf32>
    %cst_16 = arith.constant dense<0.000000e+00> : vector<4xf32>
    %37 = vector.multi_reduction <add>, %36, %cst_16 [1] : vector<4x2xf32> to vector<4xf32>
    %38 = vector.shape_cast %37 : vector<4xf32> to vector<4x1xf32>
    %39 = arith.addf %34, %38 : vector<4x1xf32>
    %c0_17 = arith.constant 0 : index
    %c0_18 = arith.constant 0 : index
    %c0_19 = arith.constant 0 : index
    %40 = vector.load %arg5[%c0_17, %c0_18, %c0_19] : memref<1x4x1xf32, #tpu.memory_space<vmem>>, vector<1x4x1xf32>
    %41 = vector.shape_cast %40 : vector<1x4x1xf32> to vector<4x1xf32>
    %42 = vector.shape_cast %39 : vector<4x1xf32> to vector<1x4x1xf32>
    tpu.vector_store %arg5[%c0_17, %c0_18, %c0_19], %42 {strides = array<i32>} : memref<1x4x1xf32, #tpu.memory_space<vmem>>, vector<1x4x1xf32>,
    %c0_20 = arith.constant 0 : index
    %c0_21 = arith.constant 0 : index
    %c0_22 = arith.constant 0 : index
    %43 = vector.load %arg6[%c0_20, %c0_21, %c0_22] : memref<1x4x1xf32, #tpu.memory_space<vmem>>, vector<1x4x1xf32>
    %44 = vector.shape_cast %43 : vector<1x4x1xf32> to vector<4x1xf32>
    %cst_23 = arith.constant dense<0.000000e+00> : vector<4x2xf32>
    %45 = vector.multi_reduction <add>, %22, %cst_23 [2] : vector<4x2x128xf32> to vector<4x2xf32>
    %cst_24 = arith.constant dense<0.000000e+00> : vector<4xf32>
    %46 = vector.multi_reduction <add>, %45, %cst_24 [1] : vector<4x2xf32> to vector<4xf32>
    %47 = vector.shape_cast %46 : vector<4xf32> to vector<4x1xf32>
    %48 = arith.addf %44, %47 : vector<4x1xf32>
    %c0_25 = arith.constant 0 : index
    %c0_26 = arith.constant 0 : index
    %c0_27 = arith.constant 0 : index
    %49 = vector.load %arg6[%c0_25, %c0_26, %c0_27] : memref<1x4x1xf32, #tpu.memory_space<vmem>>, vector<1x4x1xf32>
    %50 = vector.shape_cast %49 : vector<1x4x1xf32> to vector<4x1xf32>
    %51 = vector.shape_cast %48 : vector<4x1xf32> to vector<1x4x1xf32>
    tpu.vector_store %arg6[%c0_25, %c0_26, %c0_27], %51 {strides = array<i32>} : memref<1x4x1xf32, #tpu.memory_space<vmem>>, vector<1x4x1xf32>,
    %c0_28 = arith.constant 0 : index
    %c0_29 = arith.constant 0 : index
    %c0_30 = arith.constant 0 : index
    %52 = vector.load %arg7[%c0_28, %c0_29, %c0_30] : memref<1x4x1xf32, #tpu.memory_space<vmem>>, vector<1x4x1xf32>
    %53 = vector.shape_cast %52 : vector<1x4x1xf32> to vector<4x1xf32>
    %cst_31 = arith.constant dense<0.000000e+00> : vector<4x2xf32>
    %54 = vector.multi_reduction <add>, %12, %cst_31 [2] : vector<4x2x128xf32> to vector<4x2xf32>
    %cst_32 = arith.constant dense<0.000000e+00> : vector<4xf32>
    %55 = vector.multi_reduction <add>, %54, %cst_32 [1] : vector<4x2xf32> to vector<4xf32>
    %56 = vector.shape_cast %55 : vector<4xf32> to vector<4x1xf32>
    %57 = arith.addf %53, %56 : vector<4x1xf32>
    %c0_33 = arith.constant 0 : index
    %c0_34 = arith.constant 0 : index
    %c0_35 = arith.constant 0 : index
    %58 = vector.load %arg7[%c0_33, %c0_34, %c0_35] : memref<1x4x1xf32, #tpu.memory_space<vmem>>, vector<1x4x1xf32>
    %59 = vector.shape_cast %58 : vector<1x4x1xf32> to vector<4x1xf32>
    %60 = vector.shape_cast %57 : vector<4x1xf32> to vector<1x4x1xf32>
    tpu.vector_store %arg7[%c0_33, %c0_34, %c0_35], %60 {strides = array<i32>} : memref<1x4x1xf32, #tpu.memory_space<vmem>>, vector<1x4x1xf32>,
    return
  }
  func.func @transform_0(%arg0: i32, %arg1: i32) -> (i32, i32, i32, i32) {
    %c0_i32 = arith.constant 0 : i32
    %c0_i32_0 = arith.constant 0 : i32
    %c0_i32_1 = arith.constant 0 : i32
    return %arg0, %c0_i32, %arg1, %c0_i32_0 : i32, i32, i32, i32
  }
  func.func @transform_1(%arg0: i32, %arg1: i32) -> (i32, i32, i32) {
    %c0_i32 = arith.constant 0 : i32
    %c0_i32_0 = arith.constant 0 : i32
    return %arg0, %arg1, %c0_i32 : i32, i32, i32
  }
  func.func @transform_2(%arg0: i32, %arg1: i32) -> (i32, i32, i32) {
    %c0_i32 = arith.constant 0 : i32
    %c0_i32_0 = arith.constant 0 : i32
    return %arg0, %arg1, %c0_i32 : i32, i32, i32
  }
  func.func @transform_3(%arg0: i32, %arg1: i32) -> (i32, i32, i32) {
    %c0_i32 = arith.constant 0 : i32
    %c0_i32_0 = arith.constant 0 : i32
    %c0_i32_1 = arith.constant 0 : i32
    return %arg0, %c0_i32, %c0_i32_0 : i32, i32, i32
  }
  func.func @transform_4(%arg0: i32, %arg1: i32) -> (i32, i32, i32) {
    %c0_i32 = arith.constant 0 : i32
    %c0_i32_0 = arith.constant 0 : i32
    %c0_i32_1 = arith.constant 0 : i32
    return %arg0, %c0_i32, %c0_i32_0 : i32, i32, i32
  }
  func.func @transform_5(%arg0: i32, %arg1: i32) -> (i32, i32, i32) {
    %c0_i32 = arith.constant 0 : i32
    %c0_i32_0 = arith.constant 0 : i32
    %c0_i32_1 = arith.constant 0 : i32
    return %arg0, %c0_i32, %c0_i32_0 : i32, i32, i32
  }
}

</mosaic_0001>

<bundles_post_ra>
// kernel: tpu_custom_call.1
= control target key start
LH: loop header
LB: loop body
LE: loop exit
PB: predicated region body
PF: predicated region fallthrough
CT: control target
= control target key end

     0   :  { %s1352_s0 = inlined_call_operand.hbm [shape: f32[2,4,2,128], index: 0, kind: input, shape index: {}]   ;;  %s1353_s1 = inlined_call_operand.hbm [shape: s32[2,2,128], index: 1, kind: input, shape index: {}]   ;;  %s1354_s2 = inlined_call_operand.hbm [shape: f32[2,2,128], index: 2, kind: output, shape index: {0}]   ;;  %s1355_s3 = inlined_call_operand.vmem [shape: f32[2,4,1], index: 3, kind: output, shape index: {1}]   ;;  %s1356_s4 = inlined_call_operand.vmem [shape: f32[2,4,1], index: 4, kind: output, shape index: {2}]   ;;  %s1357_s5 = inlined_call_operand.vmem [shape: f32[2,4,1], index: 5, kind: output, shape index: {3}]  }
   0x1   :  { %1360 = sst [smem:[#allocation11_spill]] %s1352_s0 }
   0x2   :  { %11 = vsyncpa [#allocation3], 0 }
   0x3   :  { %13 = vsyncpa [#allocation3 + $0x1], 0 }
   0x4   :  { %14 = vsyncpa [#allocation6], 0 }
   0x5   :  { %16 = vsyncpa [#allocation6 + $0x1], 0 }
   0x6   :  { %17 = vsyncpa [#allocation4], 0 }
   0x7   :  { %19 = vsyncpa [#allocation4 + $0x1], 0  ;;  %s1045_s18 = smov 0   ;;  %s1047_s19 = smov 0  }
   0x8   :  { %s1049_s20 = smov 0   ;;  %s1051_s21 = smov 0  }
   0x9   :  { %s1053_s22 = smov 0   ;;  %s1055_s23 = smov 0  }
   0xa LB: > { %s754_s24 = sadd.s32 4294967295, %s1007_s23   ;;  %s755_s25 = sadd.s32 4294967294, %s1007_s23   ;;  %s1007_s23 = sphi %s1055_s23, %s25_s23   ;;  %s1003_s22 = sphi %s1053_s22, %s1378_s22   ;;  %s999_s21 = sphi %s1051_s21, %s1377_s21   ;;  %s995_s20 = sphi %s1049_s20, %s1376_s20   ;;  %s991_s19 = sphi %s1047_s19, %s1375_s19   ;;  %s987_s18 = sphi %s1045_s18, %s1374_s18  }
   0xb   : > { %s37_s26 = sadd.s32 1, %s1003_s22  ;;  %s46_s27 = sadd.s32 1, %s995_s20 }
   0xc   : > { %p39_p0 = scmp.ge.s32.totalorder %s37_s26, 2  ;;  %p53_p1 = scmp.ne.s32.totalorder %s995_s20, %s991_s19 }
   0xd   : > { %p54_p2 = scmp.eq.s32.totalorder %s1007_s23, 0  ;;  %p59_p3 = scmp.ne.s32.totalorder %s991_s19, %s987_s18 }
   0xe   : > { %s1380_s26 = smov (%p39_p0, %s37_s26), 0  ;;  %p60_p5 = scmp.eq.s32.totalorder %s754_s24, 0 }
   0xf   : > { %p1086_p4 = por %p54_p2, %p53_p1  ;;  %s41_s29 = ssub.s32 %s1003_s22, %s1380_s26 }
  0x10   : > { %p113_p6 = scmp.eq.s32.totalorder %s754_s24, 1  ;;  %p44_p7 = scmp.eq.s32.totalorder %s41_s29, 0 }
  0x11   : > { %p1092_p8 = por %p60_p5, %p59_p3  ;;  %p119_p10 = scmp.eq.s32.totalorder %s755_s25, 1 }
  0x12   : > { %p1096_p9 = por %p113_p6, %p53_p1  ;;  %p796_p13 = scmp.lt.s32.totalorder %s1007_s23, 2 }
  0x13   : > { %s1362_s30 = scalar_select %p1092_p8, 1, 0 }
  0x14   : > { %s1363_s6 = scalar_select %p1096_p9, 1, 0 }
  0x15   : > { %s1101_s7 = scalar_select %p44_p7, %s995_s20, %s46_s27  }
  0x16   : > { %p1103_p11 = por %p119_p10, %p59_p3  ;;  %s1110_s9 = sand.u32 1, %s995_s20  }
  0x17   : > { %s758_s10 = sshll.u32 %s1110_s9, 3  ;;  %s778_s11 = sshll.u32 %s1003_s22, 7 }
  0x18   : > { %s1364_s8 = scalar_select %p1103_p11, 1, 0 }
  0x19   : > { %s1365_s0 = sld [smem:[#allocation11_spill]]  ;;  %s221_s15 = scalar_lea.vmem [#allocation2], %s758_s10 }
  0x1a   : > { %s229_s16 = sshll.u32 %s221_s15, 4  ;;  %p1123_p0 = pnand %p796_p13, %p1086_p4  ;;  %s1119_s16 = int_to_ptr.vmem [resolvable:$true] %s229_s16 }
  0x1b   : > { %s218_s24 = scalar_lea.sflag [#allocation3], %s1110_s9 }
  0x1c   : > { %p863_p3 = pneg %p1123_p0 }
  0x1f   : > { %s1117_s14 = scalar_lea.hbm %s1365_s0, %s778_s11  ;;  %s866_s28 = scalar_lea.hbm %s1365_s0, 256 }
  0x20   : > { %s861_s25 = scalar_lea.hbm %s1117_s14, 128  ;;  %p867_p4 = scmp.lt.u32.totalorder %s1117_s14, %s1365_s0 }
  0x21   : > { %p862_p2 = scmp.ne.s32.totalorder %s1117_s14, %s861_s25  ;;  %p868_p7 = scmp.lt.u32.totalorder %s866_s28, %s861_s25 }
  0x22   : > { %p870_p13 = scmp.lt.u32.totalorder %s861_s25, %s1117_s14 }
  0x23   : > { %p864_p5 = pnand %p863_p3, %p862_p2  ;;  %p869_p10 = por %p868_p7, %p867_p4 }
  0x25   : > { %p865_p6 = pneg %p864_p5  ;;  %p871_p12 = por %p870_p13, %p869_p10 }
  0x27   : > { %p872_p1 = pnand %p871_p12, %p865_p6 }
  0x29   : > { %875 = shalt.err (!%p872_p1)
}
  0x2a   : > { %s876_s12 = scalar_lea.vmem %s1119_s16, 128  ;;  %s1009_s13 = smov [#allocation2]  }
  0x2b   : > { %p877_p2 = scmp.ne.s32.totalorder %s1119_s16, %s876_s12  ;;  %s881_s15 = sshll.u32 %s1009_s13, 4  ;;  %s882_s15 = int_to_ptr.vmem [resolvable:$false] %s881_s15 }
  0x2c   : > { %s883_s27 = scalar_lea.vmem %s882_s15, 256  ;;  %p884_p9 = scmp.lt.s32.totalorder %s1119_s16, %s882_s15 }
  0x2d   : > { %p879_p5 = pnand %p877_p2, %p863_p3  ;;  %p885_p4 = scmp.lt.s32.totalorder %s883_s27, %s876_s12 }
  0x2f   : > { %p880_p11 = pneg %p879_p5  ;;  %p886_p7 = por %p885_p4, %p884_p9 }
  0x31   : > { %p887_p10 = pnand %p886_p7, %p880_p11 }
  0x33   : > { %890 = shalt.err (!%p887_p10)
}
  0x34   : > { %s1010_s25 = smov 32   ;;  %s1011_s29 = smov 2  }
  0x35   : > { %788 = dma.hbm_to_vmem [thread:$0]  (!%p1123_p0), %s1117_s14, 128, %s1119_s16, %s218_s24, %s1010_s25, %s1010_s25, %s1011_s29  }
  0x36   : > { %p256_p12 = scmp.lt.s32.totalorder %s1007_s23, 3  ;;  %s761_s28 = sshll.u32 %s1110_s9, 1 }
  0x37   : > { %s762_s10 = sshll.u32 %s1003_s22, 5  ;;  %p1367_p9 = scmp.ge.s32.totalorder %s1007_s23, 1 }
  0x38   : > { %s1168_s15 = scalar_lea.hbm %s1353_s1, %s762_s10  ;;  %s243_s27 = scalar_lea.vmem [#allocation5], %s761_s28 }
  0x39   : > { %p1161_p11 = pnand %p1367_p9, %p256_p12  ;;  %s251_s0 = sshll.u32 %s243_s27, 4  ;;  %s252_s0 = int_to_ptr.vmem [resolvable:$true] %s251_s0 }
  0x3a   : > { %s240_s14 = scalar_lea.sflag [#allocation6], %s1110_s9  ;;  %s891_s16 = scalar_lea.hbm %s1168_s15, 32 }
  0x3b   : > { %s1368_s11 = scalar_select %p1161_p11, 1, 0 }
  0x3c   : > { %p892_p1 = scmp.ne.s32.totalorder %s1168_s15, %s891_s16  ;;  %s896_s29 = scalar_lea.hbm %s1353_s1, 64 }
  0x3d   : > { %p897_p2 = scmp.lt.u32.totalorder %s1168_s15, %s1353_s1  ;;  %p898_p5 = scmp.lt.u32.totalorder %s896_s29, %s891_s16 }
  0x3e   : > { %p894_p6 = pnand %p892_p1, %p863_p3  ;;  %p900_p7 = scmp.lt.u32.totalorder %s891_s16, %s1168_s15 }
  0x3f   : > { %p899_p4 = por %p898_p5, %p897_p2 }
  0x40   : > { %p895_p13 = pneg %p894_p6 }
  0x41   : > { %p901_p10 = por %p900_p7, %p899_p4 }
  0x43   : > { %p902_p12 = pnand %p901_p10, %p895_p13 }
  0x45   : > { %905 = shalt.err (!%p902_p12)
}
  0x46   : > { %s906_s9 = scalar_lea.vmem %s252_s0, 32  ;;  %s1012_s28 = smov [#allocation5]  }
  0x47   : > { %p907_p9 = scmp.ne.s32.totalorder %s252_s0, %s906_s9  ;;  %s911_s13 = sshll.u32 %s1012_s28, 4  ;;  %s912_s13 = int_to_ptr.vmem [resolvable:$false] %s911_s13 }
  0x48   : > { %s913_s27 = scalar_lea.vmem %s912_s13, 64  ;;  %p914_p8 = scmp.lt.s32.totalorder %s252_s0, %s912_s13 }
  0x49   : > { %p909_p1 = pnand %p907_p9, %p863_p3  ;;  %p915_p11 = scmp.lt.s32.totalorder %s913_s27, %s906_s9 }
  0x4b   : > { %p910_p6 = pneg %p909_p1  ;;  %p916_p2 = por %p915_p11, %p914_p8 }
  0x4d   : > { %p917_p5 = pnand %p916_p2, %p910_p6 }
  0x4f   : > { %920 = shalt.err (!%p917_p5)
}
  0x50   : > { %791 = dma.hbm_to_vmem [thread:$0]  (!%p1123_p0), %s1168_s15, 32, %s252_s0, %s240_s14  }
  0x51   : > { %p1369_p13 = scmp.ne.s32.totalorder %s1368_s11, 0 }
  0x52   : > { %s1193_s16 = sand.u32 (!%p1369_p13), 1, %s991_s19   ;;  %p1370_p3 = scmp.ne.s32.totalorder (!%p1369_p13), %s1362_s30, 0 }
  0x53   : > { %260 = sbr.rel (%p1369_p13) target bundleno = 449 (0x1c1), region = 28  ;;  %s764_s24 = sshll.u32 (!%p1369_p13), %s1193_s16, 3 }
  0x54   : > { %s263_s25 = scalar_lea.sflag (!%p1369_p13), [#allocation3], %s1193_s16  ;;  %s266_s29 = scalar_lea.vmem (!%p1369_p13), [#allocation2], %s764_s24 }
  0x5a   : > { %974 = dma.done.wait (%p1370_p3), %s263_s25, 128  }
  0x5b   : > { %976 = vsyncadd (%p1370_p3), %s263_s25, 4294967168  ;;  %s765_s0 = sshll.u32 %s1193_s16, 1  ;;  %s272_s17 = scalar_lea.sflag [#allocation6], %s1193_s16 }
  0x5c   : > { %s275_s11 = scalar_lea.vmem [#allocation5], %s765_s0 }
  0x5d   : > { %978 = dma.done.wait (%p1370_p3), %s272_s17, 32  }
  0x5e   : > { %980 = vsyncadd (%p1370_p3), %s272_s17, 4294967264  ;;  %vm356_vm0 = vcmask 1041408   ;;  %v343_v0 = vld [vmem:[%s275_s11] sm:$0x3]  ;;  %v339_v1 = vld [vmem:[%s266_s29] sm:$0x3] }
  0x5f   : > { %v340_v2 = vld [vmem:[%s266_s29 + $0x2] sm:$0x3]  ;;  %vm344_vm1 = vcmp.eq.s32.totalorder %v343_v0, 0  ;;  %v357_v3 = vsel %vm356_vm0, %v339_v1, -inf  ;;  %vm345_vm2 = vcmp.eq.s32.totalorder %v343_v0, 1  ;;  %v1013_v6 = vmov 0.0  }
  0x60   : > { %v358_v4 = vsel %vm356_vm0, %v340_v2, -inf  ;;  %v341_v5 = vld [vmem:[%s266_s29 + $0x4] sm:$0x3]  ;;  %v770_v7 = vsel %vm344_vm1, 1.0, %v1013_v6  ;;  %v771_v8 = vsel %vm345_vm2, 1.0, %v1013_v6  ;;  %vm346_vm3 = vcmp.eq.s32.totalorder %v343_v0, 2 }
  0x61   : > { %v361_v9 = vmax.f32 %v357_v3, %v358_v4  ;;  %v342_v10 = vld [vmem:[%s266_s29 + $0x6] sm:$0x3]  ;;  %v500_v11 = vsel %vm356_vm0, %v770_v7, 0.0  ;;  %v388_v12 = vmul.f32 %v770_v7, %v339_v1  ;;  %v503_v13 = vsel %vm356_vm0, %v771_v8, 0.0  ;;  %p319_p8 = scmp.lt.s32.totalorder %s999_s21, 1  ;;  %s775_s29 = sshll.u32 %s999_s21, 5 }
  0x62   : > { %v389_v14 = vmul.f32 %v771_v8, %v340_v2  ;;  %501 = vadd.xlane.f32.xlu0 %v500_v11  ;;  %504 = vadd.xlane.f32.xlu1 %v503_v13  ;;  %v772_v15 = vsel %vm346_vm3, 1.0, %v1013_v6  ;;  %v359_v16 = vsel %vm356_vm0, %v341_v5, -inf  ;;  %v360_v17 = vsel %vm356_vm0, %v342_v10, -inf  ;;  %s300_s17 = scalar_lea.vmem [#allocation7], %s765_s0  ;;  %s542_s10 = scalar_lea.sflag [#allocation4], %s1193_s16 }
  0x63   : > { %vm347_vm4 = vcmp.eq.s32.totalorder %v343_v0, 3  ;;  %v392_v18 = vsel %vm356_vm0, %v388_v12, 0.0  ;;  %v506_v20 = vsel %vm356_vm0, %v772_v15, 0.0  ;;  %v362_v21 = vmax.f32 %v359_v16, %v360_v17  ;;  %s320_s30 = scalar_select %p319_p8, %s999_s21, 1 }
  0x64   : > { %v393_v19 = vsel %vm356_vm0, %v389_v14, 0.0  ;;  %v390_v23 = vmul.f32 %v772_v15, %v341_v5  ;;  %v773_v24 = vsel %vm347_vm4, 1.0, %v1013_v6  ;;  %vm335_vm5 = vcmask 3072   ;;  %s568_s11 = sshll.u32 %s300_s17, 4  ;;  %p1371_p11 = scmp.ne.s32.totalorder %s1363_s6, 0  ;;  %s569_s11 = int_to_ptr.vmem [resolvable:$true] %s568_s11 }
  0x65   : > { %v394_v22 = vadd.f32 %v393_v19, %v392_v18  ;;  %v1222_v25 = vmax.f32 %v361_v9, %v362_v21  ;;  %v391_v26 = vmul.f32 %v773_v24, %v342_v10  ;;  %v509_v3 = vsel %vm356_vm0, %v773_v24, 0.0  ;;  %s1250_s15 = sshll.u32 %s320_s30, 2  ;;  %s921_s9 = scalar_lea.vmem %s569_s11, 32 }
  0x66   : > { %507 = vadd.xlane.f32.xlu0 %v506_v20  ;;  %v395_v27 = vsel %vm356_vm0, %v390_v23, 0.0  ;;  %s1256_s12 = scalar_lea.vmem %s1355_s3, %s1250_s15  ;;  %vm443_vm6 = vcmask 1041409   ;;  %vm445_vm7 = vcmask 1042434   ;;  %vm447_vm8 = vcmask 1043459   ;;  %s1278_s13 = scalar_lea.vmem %s1356_s4, %s1250_s15 }
  0x67   : > { %v365_v28 = vsub.f32 %v340_v2, %v1222_v25  ;;  %v366_v29 = vsub.f32 %v341_v5, %v1222_v25  ;;  %v367_v30 = vsub.f32 %v342_v10, %v1222_v25  ;;  %v396_v31 = vadd.f32 %v395_v27, %v394_v22  ;;  %336 = vst.msk [vmem:[%s1256_s12] sm:$0xf] %vm335_vm5, %v1013_v6  ;;  %s1287_s25 = scalar_lea.vmem %s1357_s5, %s1250_s15  ;;  %s1300_s15 = scalar_lea.hbm %s1354_s2, %s775_s29 }
  0x68   : > { %v364_v32 = vsub.f32 %v339_v1, %v1222_v25  ;;  %v397_v33 = vsel %vm356_vm0, %v391_v26, 0.0  ;;  %vm450_vm9 = vcmask 11264   ;;  %337 = vst.msk [vmem:[%s1278_s13] sm:$0xf] %vm335_vm5, %v1013_v6  ;;  %338 = vst.msk [vmem:[%s1287_s25] sm:$0xf] %vm335_vm5, %v1013_v6  ;;  %p922_p0 = scmp.ne.s32.totalorder %s569_s11, %s921_s9 }
  0x69   : > { %v370_v34 = vmul.f32 1.442695, %v365_v28  ;;  %v372_v35 = vmul.f32 1.442695, %v366_v29  ;;  %v374_v36 = vmul.f32 1.442695, %v367_v30  ;;  %v1230_v37 = vadd.f32 %v397_v33, %v396_v31 }
  0x6a   : > { %v368_v38 = vmul.f32 1.442695, %v364_v32  ;;  %p923_p4 = pnand %p922_p0, %p1371_p11  ;;  %s1014_s28 = smov [#allocation7]  }
  0x6b   : > { %849 = vpow2.f32 %v370_v34  ;;  %s925_s27 = sshll.u32 %s1014_s28, 4  ;;  %s926_s27 = int_to_ptr.vmem [resolvable:$false] %s925_s27 }
  0x6c   : > { %851 = vpow2.f32 %v372_v35  ;;  %p924_p7 = pneg %p923_p4  ;;  %s927_s21 = scalar_lea.vmem %s926_s27, 64 }
  0x6d   : > { %853 = vpow2.f32 %v374_v36  ;;  %p928_p10 = scmp.lt.s32.totalorder %s569_s11, %s926_s27  ;;  %p929_p12 = scmp.lt.s32.totalorder %s927_s21, %s921_s9 }
  0x6e   : > { %855 = vpow2.f32 %v368_v38 }
  0x6f   : > { %p930_p9 = por %p929_p12, %p928_p10 }
  0x71   : > { %p931_p1 = pnand %p930_p9, %p924_p7 }
  0x75   : > { %v850_v39 = vpop.eup %849 }
  0x76   : > { %v852_v40 = vpop.eup %851  ;;  %v377_v42 = vsel %vm356_vm0, %v850_v39, 0.0 }
  0x77   : > { %v854_v41 = vpop.eup %853  ;;  %v379_v44 = vsel %vm356_vm0, %v852_v40, 0.0 }
  0x78   : > { %v856_v43 = vpop.eup %855  ;;  %v381_v47 = vsel %vm356_vm0, %v854_v41, 0.0 }
  0x79   : > { %v376_v45 = vsel %vm356_vm0, %v856_v43, 0.0 }
  0x7a   : > { %v378_v46 = vadd.f32 %v377_v42, %v376_v45 }
  0x7c   : > { %v380_v48 = vadd.f32 %v379_v44, %v378_v46 }
  0x7e   : > { %v1236_v49 = vadd.f32 %v381_v47, %v380_v48 }
  0x80   : > { %857 = vrcp.f32 %v1236_v49 }
  0x81   : > { %859 = vlog2.f32 %v1236_v49 }
  0x8a   : > { %v858_v50 = vpop.eup %857 }
  0x8b   : > { %v384_v51 = vmul.f32 %v858_v50, %v856_v43  ;;  %v385_v52 = vmul.f32 %v858_v50, %v850_v39  ;;  %v386_v56 = vmul.f32 %v858_v50, %v852_v40  ;;  %v387_v59 = vmul.f32 %v858_v50, %v854_v41  ;;  %v860_v47 = vpop.eup %859 }
  0x8c   : > { %v400_v48 = vmul.f32 0.6931472, %v860_v47 }
  0x8d   : > { %v458_v53 = vsel %vm356_vm0, %v384_v51, 0.0  ;;  %v405_v54 = vmul.f32 %v770_v7, %v384_v51  ;;  %v406_v55 = vmul.f32 %v771_v8, %v385_v52  ;;  %v461_v58 = vsel %vm356_vm0, %v385_v52, 0.0 }
  0x8e   : > { %459 = vadd.xlane.f32.xlu1 %v458_v53  ;;  %v407_v61 = vmul.f32 %v772_v15, %v386_v56  ;;  %v464_v62 = vsel %vm356_vm0, %v386_v56, 0.0  ;;  %v408_v63 = vmul.f32 %v773_v24, %v387_v59  ;;  %v467_v2 = vsel %vm356_vm0, %v387_v59, 0.0 }
  0x8f   : > { %v409_v57 = vsel %vm356_vm0, %v405_v54, 0.0  ;;  %v412_v60 = vsel %vm356_vm0, %v406_v55, 0.0  ;;  %v425_v7 = vlaneseq  ;;  %v401_v49 = vadd.f32 %v400_v48, %v1222_v25 }
  0x90   : > { %410 = vadd.xlane.f32.xlu0 %v409_v57  ;;  %v415_v0 = vsel %vm356_vm0, %v407_v61, 0.0  ;;  %v418_v1 = vsel %vm356_vm0, %v408_v63, 0.0 }
  0x91   : > { %v426_v10 = vand.u32 127, %v425_v7  ;;  %v428_v11 = vshrl.u32 %v425_v7, 7  ;;  %v402_v50 = vsub.f32 %v401_v49, %v1230_v37 }
  0x92   : > { %462 = vadd.xlane.f32.xlu1 %v461_v58 }
  0x93   : > { %v429_v14 = vsub.s32 %v426_v10, %v428_v11  ;;  %403 = vst [vmem:[%s300_s17] sm:$0x3] %v402_v50 }
  0x94   : > { %413 = vadd.xlane.f32.xlu0 %v412_v60 }
  0x96   : > { %465 = vadd.xlane.f32.xlu1 %v464_v62 }
  0x98   : > { %416 = vadd.xlane.f32.xlu0 %v415_v0 }
  0x9a   : > { %419 = vadd.xlane.f32.xlu1 %v418_v1 }
  0x9c   : > { %468 = vadd.xlane.f32.xlu0 %v467_v2 }
  0x9e   : > { %510 = vadd.xlane.f32.xlu1 %v509_v3 }
  0xef   : > { %v502_v4 = vpop.xlane.xlu0 %501  ;;  %v505_v5 = vpop.xlane.xlu1 %504 }
  0xf0   : > { %v519_v20 = vrot.slane %v502_v4, %v429_v14  ;;  %v523_v21 = vrot.slane %v505_v5, %v429_v14 }
  0xf2   : > { %v532_v33 = vsel %vm443_vm6, %v523_v21, %v519_v20 }
  0xf3   : > { %v508_v8 = vpop.xlane.xlu0 %507 }
  0xf4   : > { %v527_v31 = vrot.slane %v508_v8, %v429_v14 }
  0xf6   : > { %v533_v44 = vsel %vm445_vm7, %v527_v31, %v532_v33 }
 0x11b   : > { %v460_v9 = vpop.xlane.xlu1 %459 }
 0x11c   : > { %v477_v28 = vrot.slane %v460_v9, %v429_v14 }
 0x11d   : > { %v411_v12 = vpop.xlane.xlu0 %410 }
 0x11e   : > { %v430_v18 = vrot.slane %v411_v12, %v429_v14 }
 0x11f   : > { %v463_v13 = vpop.xlane.xlu1 %462 }
 0x120   : > { %v481_v22 = vrot.slane %v463_v13, %v429_v14 }
 0x121   : > { %v414_v15 = vpop.xlane.xlu0 %413 }
 0x122   : > { %v434_v16 = vrot.slane %v414_v15, %v429_v14  ;;  %v490_v34 = vsel %vm443_vm6, %v481_v22, %v477_v28 }
 0x123   : > { %v466_v17 = vpop.xlane.xlu1 %465 }
 0x124   : > { %v444_v24 = vsel %vm443_vm6, %v434_v16, %v430_v18  ;;  %v485_v26 = vrot.slane %v466_v17, %v429_v14 }
 0x125   : > { %v417_v19 = vpop.xlane.xlu0 %416 }
 0x126   : > { %v438_v23 = vrot.slane %v417_v19, %v429_v14  ;;  %v491_v40 = vsel %vm445_vm7, %v485_v26, %v490_v34 }
 0x127   : > { %v420_v27 = vpop.xlane.xlu1 %419 }
 0x128   : > { %v442_v29 = vrot.slane %v420_v27, %v429_v14  ;;  %v446_v30 = vsel %vm445_vm7, %v438_v23, %v444_v24 }
 0x129   : > { %v469_v32 = vpop.xlane.xlu0 %468 }
 0x12a   : > { %v489_v35 = vrot.slane %v469_v32, %v429_v14  ;;  %v448_v36 = vsel %vm447_vm8, %v442_v29, %v446_v30 }
 0x12b   : > { %v511_v38 = vpop.xlane.xlu1 %510  ;;  %v451_v39 = vsel %vm450_vm9, %v448_v36, 0.0 }
 0x12c   : > { %v531_v41 = vrot.slane %v511_v38, %v429_v14  ;;  %452 = vadd.xlane.f32.xlu0 %v451_v39  ;;  %v492_v42 = vsel %vm447_vm8, %v489_v35, %v491_v40 }
 0x12d   : > { %v494_v43 = vsel %vm450_vm9, %v492_v42, 0.0 }
 0x12e   : > { %495 = vadd.xlane.f32.xlu1 %v494_v43  ;;  %v534_v45 = vsel %vm447_vm8, %v531_v41, %v533_v44 }
 0x12f   : > { %v536_v46 = vsel %vm450_vm9, %v534_v45, 0.0 }
 0x130   : > { %537 = vadd.xlane.f32.xlu0 %v536_v46 }
 0x131   : > { %934 = shalt.err (!%p931_p1)
}
 0x132   : > { %s935_s16 = scalar_lea.hbm %s1300_s15, 32  ;;  %s939_s29 = scalar_lea.hbm %s1354_s2, 64 }
 0x133   : > { %p936_p6 = scmp.ne.s32.totalorder %s1300_s15, %s935_s16  ;;  %p940_p13 = scmp.lt.u32.totalorder %s1300_s15, %s1354_s2 }
 0x134   : > { %p941_p3 = scmp.lt.u32.totalorder %s939_s29, %s935_s16  ;;  %p943_p0 = scmp.lt.u32.totalorder %s935_s16, %s1300_s15 }
 0x135   : > { %p937_p2 = pnand %p936_p6, %p1371_p11 }
 0x136   : > { %p942_p8 = por %p941_p3, %p940_p13 }
 0x137   : > { %p938_p5 = pneg %p937_p2 }
 0x138   : > { %p944_p4 = por %p943_p0, %p942_p8 }
 0x13a   : > { %p945_p7 = pnand %p944_p4, %p938_p5 }
 0x13c   : > { %948 = shalt.err (!%p945_p7)
}
 0x13d   : > { %783 = dma.vmem_to_hbm [thread:$0]  (%p1371_p11), %s569_s11, 32, %s1300_s15, %s542_s10   ;;  %v404_v6 = vld [vmem:[%s1256_s12] sm:$0xf] }
 0x13e   : > { %v457_v37 = vld [vmem:[%s1278_s13] sm:$0xf] }
 0x13f   : > { %v499_v53 = vld [vmem:[%s1287_s25] sm:$0xf] }
 0x1b9   : > { %v453_v25 = vpop.xlane.xlu0 %452 }
 0x1ba   : > { %v454_v51 = vadd.f32 %v453_v25, %v404_v6 }
 0x1bb   : > { %v496_v52 = vpop.xlane.xlu1 %495 }
 0x1bc   : > { %456 = vst.msk [vmem:[%s1256_s12] sm:$0xf] %vm335_vm5, %v454_v51  ;;  %v497_v54 = vadd.f32 %v496_v52, %v457_v37 }
 0x1bd   : > { %v538_v55 = vpop.xlane.xlu0 %537 }
 0x1be   : > { %498 = vst.msk [vmem:[%s1278_s13] sm:$0xf] %vm335_vm5, %v497_v54  ;;  %v539_v56 = vadd.f32 %v538_v55, %v499_v53 }
 0x1c0   : > { %540 = vst.msk [vmem:[%s1287_s25] sm:$0xf] %vm335_vm5, %v539_v56 }
 0x1c1 PF: > { %s589_s6 = sand.u32 1, %s987_s18   ;;  %p1372_p11 = scmp.ne.s32.totalorder %s1364_s8, 0 }
 0x1c2   : > { %p1373_p10 = scmp.ge.s32.totalorder %s1007_s23, 2  ;;  %s590_s11 = scalar_lea.sflag [#allocation4], %s589_s6 }
 0x1c4   : > { %p793_p12 = pnand %p1373_p10, %p1372_p11 }
 0x1c6   : > { %982 = dma.done.wait (!%p793_p12), %s590_s11, 32  }
 0x1c7   : > { %984 = vsyncadd (!%p793_p12), %s590_s11, 4294967264  ;;  %s25_s23 = sadd.s32 1, %s1007_s23   ;;  %s1374_s18 = smov %s991_s19 }
 0x1c8   : > { %p22_p9 = scmp.ge.s32.totalorder %s25_s23, 4   ;;  %s1375_s19 = smov %s995_s20 }
 0x1c9   : > { %s1376_s20 = smov %s1101_s7  ;;  %s1377_s21 = smov %s1003_s22 }
 0x1ca   : > { %s1378_s22 = smov %s1380_s26  ;;  %24 = sbr.rel (!%p22_p9) target bundleno = 10 (0xa), region = 126 }
 0x1d1   :  { %616 = vsyncpa [#allocation3], 1 }
 0x1d2   :  { %618 = vsyncpa [#allocation3 + $0x1], 1 }
 0x1d3   :  { %619 = vsyncpa [#allocation6], 1 }
 0x1d4   :  { %621 = vsyncpa [#allocation6 + $0x1], 1 }
 0x1d5   :  { %622 = vsyncpa [#allocation4], 1 }
 0x1d6   :  { %624 = vsyncpa [#allocation4 + $0x1], 1 }

</bundles_post_ra>
